<compile_context>
chip_gen: v6e
topology: v6e:2x2x1
jax: 0.10.0
libtpu: 0.0.40
codegen_flags: <defaults>
</compile_context>

<pallas_src>
import math

import jax
import jax.numpy as jnp
from jax.experimental import pallas as pl
from jax.experimental.pallas import tpu as pltpu

_LANE = 128       # lane width; output padded to a multiple of this
_SUBLANE = 8      # f32 sublane granularity for the batch tile


# -----------------------------------------------------------------------------
# Pallas kernel: fused 3-layer MLP (2 hidden tanh layers + linear output head)
# -----------------------------------------------------------------------------
def _mlp_kernel(x_ref, w1_ref, b1_ref, w2_ref, b2_ref, w3_ref, b3_ref, o_ref):
    x = x_ref[...].astype(jnp.float32)          # x_raw.float()
    # hidden layer 1: Linear + tanh
    h = jnp.dot(x, w1_ref[...], preferred_element_type=jnp.float32) + b1_ref[...]
    h = jnp.tanh(h)
    # hidden layer 2: Linear + tanh
    h = jnp.dot(h, w2_ref[...], preferred_element_type=jnp.float32) + b2_ref[...]
    h = jnp.tanh(h)
    # output layer: Linear (no activation); o_ref is lane-dense (padded cols)
    o_ref[...] = (jnp.dot(h, w3_ref[...], preferred_element_type=jnp.float32)
                  + b3_ref[...]).astype(o_ref.dtype)


def _round_up(v, m):
    return ((v + m - 1) // m) * m


def mlp_forward(x, params, *, tile_n=512):
    """Run the fused MLP Pallas kernel.

    x:      [N, input_dim]  (any float dtype; cast to f32 inside the kernel)
    params: dict with w1 [D_in,H1], b1 [1,H1], w2 [H1,H2], b2 [1,H2],
            w3 [H2,D_out], b3 [1,D_out]
    tile_n: batch tile size for large batches (multiple of 256 recommended
            for v6e/v7x); small batches run in a single block.
    """
    n, d_in = x.shape
    h1 = params["w1"].shape[1]
    h2 = params["w2"].shape[1]
    d_out = params["w3"].shape[1]

    # ---- lane-dense output: pad final weight/bias columns to 128 multiple ----
    d_out_p = _round_up(max(d_out, _LANE), _LANE)
    w3p = jnp.pad(params["w3"], ((0, 0), (0, d_out_p - d_out)))
    b3p = jnp.pad(params["b3"], ((0, 0), (0, d_out_p - d_out)))

    # ---- choose batch tile: single block for small N, else tile_n ------------
    if n <= tile_n:
        tn = _round_up(max(n, _SUBLANE), _SUBLANE)   # one block covers the batch
    else:
        tn = tile_n
    n_p = _round_up(n, tn)
    x_p = jnp.pad(x, ((0, n_p - n), (0, 0))) if n_p != n else x
    grid = (n_p // tn,)

    # ---- cost estimate (advisory) -------------------------------------------
    weight_bytes = 4 * (d_in * h1 + h1 + h1 * h2 + h2 + h2 * d_out_p + d_out_p)
    cost = pl.CostEstimate(
        flops=2 * n_p * (d_in * h1 + h1 * h2 + h2 * d_out_p),
        transcendentals=n_p * (h1 + h2),
        bytes_accessed=n_p * (d_in + d_out_p) * 4 + weight_bytes,
    )

    # Weights/biases: full-array blocks, same block for every grid step.
    full = lambda shape: pl.BlockSpec(shape, lambda i: (0, 0))

    out_p = pl.pallas_call(
        _mlp_kernel,
        out_shape=jax.ShapeDtypeStruct((n_p, d_out_p), jnp.float32),
        grid_spec=pltpu.PrefetchScalarGridSpec(
            num_scalar_prefetch=0,
            grid=grid,
            in_specs=[
                pl.BlockSpec((tn, d_in), lambda i: (i, 0)),       # x tile
                full((d_in, h1)), full((1, h1)),                  # layer 1
                full((h1, h2)),   full((1, h2)),                  # layer 2
                full((h2, d_out_p)), full((1, d_out_p)),          # output layer
            ],
            out_specs=pl.BlockSpec((tn, d_out_p), lambda i: (i, 0)),
        ),
        compiler_params=pltpu.CompilerParams(
            dimension_semantics=("parallel",),
        ),
        cost_estimate=cost,
    )(x_p, params["w1"], params["b1"], params["w2"], params["b2"], w3p, b3p)

    # Slice off batch padding and lane padding of the output.
    return out_p[:n, :d_out]


# -----------------------------------------------------------------------------
# Deterministic parameter init (xavier_normal_ weights, zero biases),
# matching NNModel.__init__ semantics.
# -----------------------------------------------------------------------------
def init_params(key, input_dim, hidden_neurons, output_dim):
    dims = [input_dim] + list(hidden_neurons) + [output_dim]
    params = {}
    keys = jax.random.split(key, len(dims) - 1)
    for idx, (fan_in, fan_out) in enumerate(zip(dims[:-1], dims[1:]), start=1):
        std = math.sqrt(2.0 / (fan_in + fan_out))  # xavier normal (gain=1)
        # Stored as [in, out] (transpose of the PyTorch [out, in] layout).
        params[f"w{idx}"] = (std * jax.random.normal(keys[idx - 1],
                                                     (fan_in, fan_out))
                             ).astype(jnp.float32)
        params[f"b{idx}"] = jnp.zeros((1, fan_out), dtype=jnp.float32)
    return params


def mlp_reference(x, params):
    """Pure-JAX reference matching NNModel.forward (g0_func/d_func = None)."""
    h = x.astype(jnp.float32)
    h = jnp.tanh(h @ params["w1"] + params["b1"])
    h = jnp.tanh(h @ params["w2"] + params["b2"])
    return h @ params["w3"] + params["b3"]


if __name__ == "__main__":
    # Small shapes consistent with the module: an MLP on flat feature vectors.
    input_dim = 4
    hidden_neurons = (32, 32)
    output_dim = 2
    batch = 16

    key = jax.random.PRNGKey(0)
    k_params, k_x = jax.random.split(key)

    params = init_params(k_params, input_dim, hidden_neurons, output_dim)
    x = jax.random.normal(k_x, (batch, input_dim), dtype=jnp.float32)

    # TODO(synk): g0_func / d_func are user-supplied callables (None by
    # default); only the default path (raw MLP output) is implemented here.
    out = mlp_forward(x, params)          # small batch -> single-block kernel
    out = jax.block_until_ready(out)

    ref = mlp_reference(x, params)
    assert out.shape == (batch, output_dim)
    assert jnp.allclose(out, ref, atol=1e-5, rtol=1e-5), "mismatch vs reference"

    # Also exercise the tiled (multi-grid-step) path with a larger batch.
    big_batch = 1030                       # non-multiple of tile to test padding
    xb = jax.random.normal(jax.random.PRNGKey(1), (big_batch, input_dim),
                           dtype=jnp.float32)
    out_b = jax.block_until_ready(mlp_forward(xb, params, tile_n=512))
    ref_b = mlp_reference(xb, params)
    assert out_b.shape == (big_batch, output_dim)
    assert jnp.allclose(out_b, ref_b, atol=1e-5, rtol=1e-5), "mismatch (tiled)"

    print("KERNEL_OK")
</pallas_src>

<mosaic_0001>
module attributes {stable_mosaic.version = 11 : i64} {
  func.func @_mlp_kernel(%arg0: i32, %arg1: memref<16x4xf32, #tpu.memory_space<vmem>>, %arg2: memref<4x32xf32, #tpu.memory_space<vmem>>, %arg3: memref<1x32xf32, #tpu.memory_space<vmem>>, %arg4: memref<32x32xf32, #tpu.memory_space<vmem>>, %arg5: memref<1x32xf32, #tpu.memory_space<vmem>>, %arg6: memref<32x128xf32, #tpu.memory_space<vmem>>, %arg7: memref<1x128xf32, #tpu.memory_space<vmem>>, %arg8: memref<16x128xf32, #tpu.memory_space<vmem>>) attributes {dimension_semantics = [#tpu.dimension_semantics<parallel>], iteration_bounds = array<i64: 1>, scalar_prefetch = 0 : i64, scratch_operands = 0 : i64, tpu.core_type = #tpu.core_type<tc>, window_params = [{transform_indices = @transform_0, window_bounds = array<i64: 16, 4>}, {pipeline_mode = #tpu.pipeline_mode<synchronous>, transform_indices = @transform_1, window_bounds = array<i64: 4, 32>}, {pipeline_mode = #tpu.pipeline_mode<synchronous>, transform_indices = @transform_2, window_bounds = array<i64: 1, 32>}, {pipeline_mode = #tpu.pipeline_mode<synchronous>, transform_indices = @transform_3, window_bounds = array<i64: 32, 32>}, {pipeline_mode = #tpu.pipeline_mode<synchronous>, transform_indices = @transform_4, window_bounds = array<i64: 1, 32>}, {pipeline_mode = #tpu.pipeline_mode<synchronous>, transform_indices = @transform_5, window_bounds = array<i64: 32, 128>}, {pipeline_mode = #tpu.pipeline_mode<synchronous>, transform_indices = @transform_6, window_bounds = array<i64: 1, 128>}, {transform_indices = @transform_7, window_bounds = array<i64: 16, 128>}]} {
    %c0 = arith.constant 0 : index
    %c0_0 = arith.constant 0 : index
    %0 = vector.load %arg1[%c0, %c0_0] : memref<16x4xf32, #tpu.memory_space<vmem>>, vector<16x4xf32>
    %c0_1 = arith.constant 0 : index
    %c0_2 = arith.constant 0 : index
    %1 = vector.load %arg2[%c0_1, %c0_2] : memref<4x32xf32, #tpu.memory_space<vmem>>, vector<4x32xf32>
    %cst = arith.constant dense<0.000000e+00> : vector<16x32xf32>
    %2 = tpu.matmul %0, %1, %cst {dimension_numbers = #tpu.dot_dimension_numbers<[1], [0], [0], [1], [0, 0, 1, 1], [], []>} : vector<16x4xf32>, vector<4x32xf32>, vector<16x32xf32> -> vector<16x32xf32>
    %c0_3 = arith.constant 0 : index
    %c0_4 = arith.constant 0 : index
    %3 = vector.load %arg3[%c0_3, %c0_4] : memref<1x32xf32, #tpu.memory_space<vmem>>, vector<1x32xf32>
    %4 = vector.broadcast %3 : vector<1x32xf32> to vector<16x32xf32>
    %5 = arith.addf %2, %4 : vector<16x32xf32>
    %6 = math.tanh %5 : vector<16x32xf32>
    %c0_5 = arith.constant 0 : index
    %c0_6 = arith.constant 0 : index
    %7 = vector.load %arg4[%c0_5, %c0_6] : memref<32x32xf32, #tpu.memory_space<vmem>>, vector<32x32xf32>
    %cst_7 = arith.constant dense<0.000000e+00> : vector<16x32xf32>
    %8 = tpu.matmul %6, %7, %cst_7 {dimension_numbers = #tpu.dot_dimension_numbers<[1], [0], [0], [1], [0, 0, 1, 1], [], []>} : vector<16x32xf32>, vector<32x32xf32>, vector<16x32xf32> -> vector<16x32xf32>
    %c0_8 = arith.constant 0 : index
    %c0_9 = arith.constant 0 : index
    %9 = vector.load %arg5[%c0_8, %c0_9] : memref<1x32xf32, #tpu.memory_space<vmem>>, vector<1x32xf32>
    %10 = vector.broadcast %9 : vector<1x32xf32> to vector<16x32xf32>
    %11 = arith.addf %8, %10 : vector<16x32xf32>
    %12 = math.tanh %11 : vector<16x32xf32>
    %c0_10 = arith.constant 0 : index
    %c0_11 = arith.constant 0 : index
    %13 = vector.load %arg6[%c0_10, %c0_11] : memref<32x128xf32, #tpu.memory_space<vmem>>, vector<32x128xf32>
    %cst_12 = arith.constant dense<0.000000e+00> : vector<16x128xf32>
    %14 = tpu.matmul %12, %13, %cst_12 {dimension_numbers = #tpu.dot_dimension_numbers<[1], [0], [0], [1], [0, 0, 1, 1], [], []>} : vector<16x32xf32>, vector<32x128xf32>, vector<16x128xf32> -> vector<16x128xf32>
    %c0_13 = arith.constant 0 : index
    %c0_14 = arith.constant 0 : index
    %15 = vector.load %arg7[%c0_13, %c0_14] : memref<1x128xf32, #tpu.memory_space<vmem>>, vector<1x128xf32>
    %16 = vector.broadcast %15 : vector<1x128xf32> to vector<16x128xf32>
    %17 = arith.addf %14, %16 : vector<16x128xf32>
    %c0_15 = arith.constant 0 : index
    %c0_16 = arith.constant 0 : index
    %18 = vector.load %arg8[%c0_15, %c0_16] : memref<16x128xf32, #tpu.memory_space<vmem>>, vector<16x128xf32>
    tpu.vector_store %arg8[%c0_15, %c0_16], %17 {strides = array<i32>} : memref<16x128xf32, #tpu.memory_space<vmem>>, vector<16x128xf32>,
    return
  }
  func.func @transform_0(%arg0: i32) -> (i32, i32) {
    %c0_i32 = arith.constant 0 : i32
    %c0_i32_0 = arith.constant 0 : i32
    return %arg0, %c0_i32 : i32, i32
  }
  func.func @transform_1(%arg0: i32) -> (i32, i32) {
    %c0_i32 = arith.constant 0 : i32
    %c0_i32_0 = arith.constant 0 : i32
    %c0_i32_1 = arith.constant 0 : i32
    return %c0_i32, %c0_i32_0 : i32, i32
  }
  func.func @transform_2(%arg0: i32) -> (i32, i32) {
    %c0_i32 = arith.constant 0 : i32
    %c0_i32_0 = arith.constant 0 : i32
    %c0_i32_1 = arith.constant 0 : i32
    return %c0_i32, %c0_i32_0 : i32, i32
  }
  func.func @transform_3(%arg0: i32) -> (i32, i32) {
    %c0_i32 = arith.constant 0 : i32
    %c0_i32_0 = arith.constant 0 : i32
    %c0_i32_1 = arith.constant 0 : i32
    return %c0_i32, %c0_i32_0 : i32, i32
  }
  func.func @transform_4(%arg0: i32) -> (i32, i32) {
    %c0_i32 = arith.constant 0 : i32
    %c0_i32_0 = arith.constant 0 : i32
    %c0_i32_1 = arith.constant 0 : i32
    return %c0_i32, %c0_i32_0 : i32, i32
  }
  func.func @transform_5(%arg0: i32) -> (i32, i32) {
    %c0_i32 = arith.constant 0 : i32
    %c0_i32_0 = arith.constant 0 : i32
    %c0_i32_1 = arith.constant 0 : i32
    return %c0_i32, %c0_i32_0 : i32, i32
  }
  func.func @transform_6(%arg0: i32) -> (i32, i32) {
    %c0_i32 = arith.constant 0 : i32
    %c0_i32_0 = arith.constant 0 : i32
    %c0_i32_1 = arith.constant 0 : i32
    return %c0_i32, %c0_i32_0 : i32, i32
  }
  func.func @transform_7(%arg0: i32) -> (i32, i32) {
    %c0_i32 = arith.constant 0 : i32
    %c0_i32_0 = arith.constant 0 : i32
    return %arg0, %c0_i32 : i32, i32
  }
}

</mosaic_0001>

<bundles_post_ra>
// kernel: tpu_custom_call.1
= control target key start
LH: loop header
LB: loop body
LE: loop exit
PB: predicated region body
PF: predicated region fallthrough
CT: control target
= control target key end

     0   :  { %12 = vsyncpa [#allocation3], 0  ;;  %s576_s0 = inlined_call_operand.vmem [shape: f32[16,4], index: 0, kind: input, shape index: {}]   ;;  %s577_s1 = inlined_call_operand.vmem [shape: f32[4,32], index: 1, kind: input, shape index: {}]   ;;  %s578_s2 = inlined_call_operand.vmem [shape: f32[1,32], index: 2, kind: input, shape index: {}]   ;;  %s579_s3 = inlined_call_operand.hbm [shape: f32[32,32], index: 3, kind: input, shape index: {}]   ;;  %s580_s4 = inlined_call_operand.vmem [shape: f32[1,32], index: 4, kind: input, shape index: {}]   ;;  %s581_s5 = inlined_call_operand.hbm [shape: f32[32,128], index: 5, kind: input, shape index: {}]   ;;  %s582_s6 = inlined_call_operand.vmem [shape: f32[1,128], index: 6, kind: input, shape index: {}]   ;;  %s583_s7 = inlined_call_operand.hbm [shape: f32[16,128], index: 7, kind: output, shape index: {}]  }
   0x1   :  { %13 = vsyncpa [#allocation6], 0 }
   0x2   :  { %14 = vsyncpa [#allocation4], 0  ;;  %s491_s24 = smov [#allocation2]  }
   0x3   :  { %s26_s25 = sshll.u32 %s491_s24, 4  ;;  %s27_s25 = int_to_ptr.vmem [resolvable:$true] %s26_s25 }
   0x4   :  { %s433_s26 = scalar_lea.vmem %s27_s25, 512  ;;  %p438_p1 = scmp.lt.s32.totalorder %s27_s25, %s27_s25 }
   0x5   :  { %p434_p0 = scmp.ne.s32.totalorder %s27_s25, %s433_s26  ;;  %p439_p2 = scmp.lt.s32.totalorder %s433_s26, %s433_s26 }
   0x7   :  { %p440_p3 = por %p439_p2, %p438_p1 }
   0x9   :  { %p441_p4 = pnand %p440_p3, %p434_p0 }
   0xb   :  { %444 = shalt.err (!%p441_p4)
}
   0xc   :  { %s492_s27 = smov 128   ;;  %s493_s28 = smov 8  }
   0xd   :  { %32 = dma.hbm_to_vmem [thread:$0]  %s579_s3, 512, %s27_s25, [#allocation3], %s492_s27, %s492_s27, %s493_s28  }
   0xe   :  { %s494_s8 = smov [#allocation5]  }
   0xf   :  { %s40_s9 = sshll.u32 %s494_s8, 4  ;;  %s41_s9 = int_to_ptr.vmem [resolvable:$true] %s40_s9 }
  0x10   :  { %s453_s10 = scalar_lea.vmem %s41_s9, 512  ;;  %p458_p6 = scmp.lt.s32.totalorder %s41_s9, %s41_s9 }
  0x11   :  { %p454_p5 = scmp.ne.s32.totalorder %s41_s9, %s453_s10  ;;  %p459_p7 = scmp.lt.s32.totalorder %s453_s10, %s453_s10 }
  0x13   :  { %p460_p8 = por %p459_p7, %p458_p6 }
  0x15   :  { %p461_p9 = pnand %p460_p8, %p454_p5 }
  0x17   :  { %464 = shalt.err (!%p461_p9)
}
  0x18   :  { %46 = dma.hbm_to_vmem [thread:$0]  %s581_s5, 512, %s41_s9, [#allocation6], %s492_s27, %s492_s27, %s493_s28  }
  0x19   :  { %485 = dma.done.wait [#allocation3], 512  }
  0x1a   :  { %486 = vsyncadd [#allocation3], 4294966784 }
  0x1b   :  { %487 = dma.done.wait [#allocation6], 512  }
  0x1c   :  { %488 = vsyncadd [#allocation6], 4294966784  ;;  %vm72_vm0 = vcmask 1043456   ;;  %vm65_vm1 = vcmask 31744   ;;  %v57_v0 = vld [vmem:[%s577_s1] sm:$0xf] }
  0x1d   :  { %v55_v1 = vld [vmem:[%s576_s0] sm:$0xff]  ;;  %v56_v2 = vld [vmem:[%s576_s0 + $0x8] sm:$0xff]  ;;  %385 = vmatprep.subr.msk.mxu0 %vm72_vm0, %v57_v0  ;;  %v156_v3 = vld [vmem:[#allocation2 + $0x18] sm:$0xff]  ;;  %vm164_vm2 = vcmask 261120   ;;  %s495_s20 = smov [#allocation7]  }
  0x1e   :  { %387 = vmatprep.mubr.msk.f32.mxu0 %vm65_vm1, %v55_v1  ;;  %386 = vmatpush3.msk.msra.mxu0 %vm72_vm0, %v57_v0  ;;  %v155_v4 = vld [vmem:[#allocation2 + $0x10] sm:$0xff]  ;;  %v154_v5 = vld [vmem:[#allocation2 + $0x8] sm:$0xff]  ;;  %v153_v6 = vld [vmem:[#allocation2] sm:$0xff]  ;;  %s347_s21 = sshll.u32 %s495_s20, 4  ;;  %s348_s21 = int_to_ptr.vmem [resolvable:$true] %s347_s21 }
  0x1f   :  { %388 = vmatmul.mubr.msk.f32.vlgmr.msra.gmra.mxu0 %vm65_vm1, %v56_v2  ;;  %390 = vmatprep.subr.mxu1 %v156_v3  ;;  %v360_v7 = vld [vmem:[%s578_s2] ss:$0 sm:$0xff]  ;;  %v251_v14 = vld [vmem:[#allocation5 + $0x18] sm:$0xff]  ;;  %v250_v15 = vld [vmem:[#allocation5 + $0x10] sm:$0xff]  ;;  %p470_p11 = scmp.lt.s32.totalorder %s348_s21, %s348_s21 }
  0x20   :  { %391 = vmatpush3.msra.mxu1 %v156_v3  ;;  %401 = vmatprep.subr.mxu0 %v251_v14  ;;  %v249_v16 = vld [vmem:[#allocation5 + $0x8] sm:$0xff]  ;;  %v248_v17 = vld [vmem:[#allocation5] sm:$0xff] }
  0x21   :  { %392 = vmatprep.subr.mxu1 %v155_v4  ;;  %402 = vmatpush3.msra.mxu0 %v251_v14  ;;  %v364_v18 = vld [vmem:[%s580_s4] ss:$0 sm:$0xff]  ;;  %s465_s4 = scalar_lea.vmem %s348_s21, 256 }
  0x22   :  { %393 = vmatpush3.msra.mxu1 %v155_v4  ;;  %403 = vmatprep.subr.mxu0 %v250_v15  ;;  %v367_v25 = vld [vmem:[%s582_s6] ss:$0 sm:$0xff]  ;;  %p466_p10 = scmp.ne.s32.totalorder %s348_s21, %s465_s4  ;;  %p471_p12 = scmp.lt.s32.totalorder %s465_s4, %s465_s4 }
  0x23   :  { %394 = vmatprep.subr.mxu1 %v154_v5  ;;  %404 = vmatpush3.msra.mxu0 %v250_v15 }
  0x24   :  { %395 = vmatpush3.msra.mxu1 %v154_v5  ;;  %405 = vmatprep.subr.mxu0 %v249_v16  ;;  %p472_p13 = por %p471_p12, %p470_p11 }
  0x25   :  { %396 = vmatprep.subr.mxu1 %v153_v6  ;;  %406 = vmatpush3.msra.mxu0 %v249_v16 }
  0x26   :  { %397 = vmatpush3.msra.mxu1 %v153_v6  ;;  %407 = vmatprep.subr.mxu0 %v248_v17  ;;  %p473_p0 = pnand %p472_p13, %p466_p10 }
  0x27   :  { %408 = vmatpush3.msra.mxu0 %v248_v17 }
  0xdf   :  { %v389_v8 = vpop.f32.mrf.mxu0 }
  0xe0   :  { %v148_v9 = vadd.f32 %v389_v8, %v360_v7 }
  0xe1   :  { %v142_v10 = vpop.f32.mrf.mxu0 }
  0xe2   :  { %v143_v11 = vadd.f32 %v360_v7, %v142_v10 }
  0xe4   :  { %417 = vtanh.f32 %v143_v11 }
  0xe5   :  { %419 = vtanh.f32 %v148_v9 }
  0xf1   :  { %v418_v12 = vpop.eup %417 }
  0xf2   :  { %v420_v13 = vpop.eup %419  ;;  %398 = vmatprep.mubr.msk.f32.mxu1 %vm164_vm2, %v418_v12 }
  0xf3   :  { %399 = vmatmul.mubr.msk.f32.vlgmr.msra.gmra.mxu1 %vm164_vm2, %v420_v13 }
 0x1b3   :  { %v400_v19 = vpop.f32.mrf.mxu1 }
 0x1b4   :  { %v243_v20 = vadd.f32 %v400_v19, %v364_v18 }
 0x1b5   :  { %v237_v21 = vpop.f32.mrf.mxu1 }
 0x1b6   :  { %v238_v22 = vadd.f32 %v364_v18, %v237_v21 }
 0x1b8   :  { %421 = vtanh.f32 %v238_v22 }
 0x1b9   :  { %423 = vtanh.f32 %v243_v20 }
 0x1c5   :  { %v422_v23 = vpop.eup %421 }
 0x1c6   :  { %v424_v24 = vpop.eup %423  ;;  %409 = vmatprep.mubr.msk.f32.mxu0 %vm164_vm2, %v422_v23 }
 0x1c7   :  { %410 = vmatmul.mubr.msk.f32.vlgmr.msra.gmra.mxu0 %vm164_vm2, %v424_v24 }
 0x287   :  { %v411_v26 = vpop.f32.mrf.mxu0 }
 0x288   :  { %v337_v27 = vadd.f32 %v411_v26, %v367_v25 }
 0x289   :  { %v331_v28 = vpop.f32.mrf.mxu0 }
 0x28a   :  { %341 = vst [vmem:[#allocation7 + $0x8] sm:$0xff] %v337_v27  ;;  %v332_v29 = vadd.f32 %v367_v25, %v331_v28 }
 0x28c   :  { %340 = vst [vmem:[#allocation7] sm:$0xff] %v332_v29 }
 0x28d   :  { %476 = shalt.err (!%p473_p0)
}
 0x28e   :  { %353 = dma.vmem_to_hbm [thread:$0]  %s348_s21, 256, %s583_s7, [#allocation4], %s492_s27, %s492_s27, %s493_s28  }
 0x28f   :  { %489 = dma.done.wait [#allocation4], 256  }
 0x290   :  { %490 = vsyncadd [#allocation4], 4294967040 }
 0x291   :  { %357 = vsyncpa [#allocation3], 1 }
 0x292   :  { %358 = vsyncpa [#allocation6], 1 }
 0x293   :  { %359 = vsyncpa [#allocation4], 1 }

</bundles_post_ra>
